<compile_context>
chip_gen: v5e
topology: v5e:2x2
jax: 0.10.0
libtpu: 0.0.40
codegen_flags: <defaults>
</compile_context>

<pallas_src>
import functools

import jax
import jax.numpy as jnp
from jax import lax
from jax.experimental import pallas as pl
from jax.experimental.pallas import tpu as pltpu

_LANES = 128


def _vmem_capacity_bytes() -> int:
    try:
        return int(pltpu.get_tpu_info().vmem_capacity_bytes)
    except Exception:
        return 64 * 1024 * 1024  # conservative (v7x per-TC VMEM)


def _sum_kernel(x_ref, o_ref, *, absolute: bool, tiles_per_core: int,
                tile_rows: int, acc_rows: int, valid_rows: int,
                full_tiles: int, has_tail: bool):
    c = pl.program_id(0)   # core / parallel slice
    i = pl.program_id(1)   # reduction step within this slice
    t = c * tiles_per_core + i   # logical tile index

    # The output block (c, 0) is resident across the reduction axis: it is the
    # accumulator.  Zero it on the first step of each slice.
    @pl.when(i == 0)
    def _():
        o_ref[...] = jnp.zeros_like(o_ref)

    tile = x_ref[...].astype(jnp.float32)
    if absolute:
        tile = jnp.abs(tile)

    def accumulate(v):
        # Leading-axis split into (acc_rows, 128) chunks: layout-preserving,
        # acc_rows/8 independent accumulator vregs keep the add chain short.
        o_ref[...] += v.reshape(-1, acc_rows, _LANES).sum(axis=0)

    if not has_tail:
        accumulate(tile)
    else:
        # Fast path: tiles that are entirely within the valid rows.
        @pl.when(t < full_tiles)
        def _():
            accumulate(tile)

        # Slow path: the single partial last tile and/or a phantom tile from
        # the 2-core cdiv split.  Keep this a select (garbage rows may be NaN).
        @pl.when(t >= full_tiles)
        def _():
            start = t * tile_rows
            row_ids = lax.broadcasted_iota(jnp.int32, tile.shape, 0)
            accumulate(jnp.where(row_ids < (valid_rows - start), tile, 0.0))


def _aligned_sum(slab: jax.Array, *, absolute: bool, tile_bytes: int,
                 itemsize: int) -> jax.Array:
    """Sum (|.| optional) of a (rows, 128) slab; returns an f32 scalar."""
    rows = slab.shape[0]
    # Sublane packing per dtype width: f32 -> 8, bf16 -> 16, int8/fp8 -> 32.
    sublane = {4: 8, 2: 16, 1: 32}.get(itemsize, 8)

    # Tiny-input corner: pad to one sublane group so the block never exceeds
    # the array extent (a few KiB at most; zeros are neutral for sum/abs-sum).
    if rows < sublane:
        slab = jnp.concatenate(
            [slab, jnp.zeros((sublane - rows, _LANES), slab.dtype)])
        rows = sublane

    # Byte-budgeted tile rows, clamped so the double-buffered block always
    # fits the generation's VMEM.
    vmem_cap = _vmem_capacity_bytes()
    tile_bytes = max(64 * _LANES * itemsize, min(tile_bytes, int(0.35 * vmem_cap)))

    if rows >= 64:
        acc_rows = 64
        tr = max(64, (tile_bytes // (_LANES * itemsize)) // 64 * 64)
        tr = min(tr, (rows // 64) * 64)          # never larger than the array
    else:
        acc_rows = (rows // sublane) * sublane   # multiple of 8, <= rows
        tr = acc_rows

    total_tiles = -(-rows // tr)
    # Always split the reduction across 2 TensorCores when there is more than
    # one tile (v7x per-TC HBM bandwidth); sequential no-op on v5e/v6e.
    num_cores = 2 if total_tiles >= 2 else 1
    tiles_per_core = -(-total_tiles // num_cores)
    num_logical = num_cores * tiles_per_core
    need_clamp = num_logical > total_tiles       # at most one phantom tile

    full_tiles = rows // tr                      # tiles with no invalid rows
    has_tail = num_logical > full_tiles

    # Only raise the scoped-VMEM limit for oversized caller-supplied budgets;
    # the default 3 MiB blocks stay under every generation's default limit.
    block_bytes = tr * _LANES * itemsize
    vmem_limit = None
    if 2 * block_bytes > (12 << 20):
        vmem_limit = min(2 * block_bytes + (2 << 20), int(0.75 * vmem_cap))

    if need_clamp:
        in_index_map = lambda c, i: (
            jnp.minimum(c * tiles_per_core + i, total_tiles - 1), 0)
    else:
        in_index_map = lambda c, i: (c * tiles_per_core + i, 0)

    kernel = functools.partial(
        _sum_kernel,
        absolute=absolute,
        tiles_per_core=tiles_per_core,
        tile_rows=tr,
        acc_rows=acc_rows,
        valid_rows=rows,
        full_tiles=full_tiles,
        has_tail=has_tail,
    )

    out = pl.pallas_call(
        kernel,
        out_shape=jax.ShapeDtypeStruct((num_cores * acc_rows, _LANES),
                                       jnp.float32),
        grid_spec=pltpu.PrefetchScalarGridSpec(
            num_scalar_prefetch=0,
            grid=(num_cores, tiles_per_core),
            in_specs=[pl.BlockSpec((tr, _LANES), in_index_map)],
            out_specs=pl.BlockSpec((acc_rows, _LANES), lambda c, i: (c, 0)),
        ),
        compiler_params=pltpu.CompilerParams(
            dimension_semantics=("parallel", "arbitrary"),
            vmem_limit_bytes=vmem_limit,
        ),
    )(slab)

    # Tiny (num_cores*64, 128) cross-lane reduce in plain JAX.
    return jnp.sum(out)


def sum_loss_pallas(x: jax.Array, absolute: bool = True, *,
                    tile_bytes: int = 3 << 20) -> jax.Array:
    """Equivalent of SumLoss.forward: sum(|x|) if absolute else sum(x)."""
    # TODO(synk): integer inputs: torch.sum promotes to int64; here we
    # accumulate in f32 and cast back, which only matches for float inputs.
    orig_dtype = x.dtype
    itemsize = jnp.dtype(orig_dtype).itemsize

    flat = x.reshape(-1)
    n = flat.shape[0]
    n_aligned = (n // _LANES) * _LANES

    total = jnp.float32(0.0)
    if n_aligned:
        slab = flat[:n_aligned].reshape(n_aligned // _LANES, _LANES)
        total = total + _aligned_sum(slab, absolute=absolute,
                                     tile_bytes=tile_bytes, itemsize=itemsize)
    if n_aligned != n:
        # <128-element remainder: sum it directly instead of copying the whole
        # flattened array just to pad one lane row.
        tail = flat[n_aligned:].astype(jnp.float32)
        if absolute:
            tail = jnp.abs(tail)
        total = total + jnp.sum(tail)

    return total.astype(orig_dtype)


if __name__ == "__main__":
    key = jax.random.PRNGKey(0)
    k0, k1, k2 = jax.random.split(key, 3)

    # Primary: conv-style NCHW input, lane-aligned, single tile.
    x = jax.random.normal(k0, (2, 4, 16, 16), dtype=jnp.float32)
    res_abs = jax.block_until_ready(sum_loss_pallas(x, absolute=True))
    res_plain = jax.block_until_ready(sum_loss_pallas(x, absolute=False))
    assert jnp.allclose(res_abs, jnp.sum(jnp.abs(x)), rtol=1e-5, atol=1e-4), (
        res_abs, jnp.sum(jnp.abs(x)))
    assert jnp.allclose(res_plain, jnp.sum(x), rtol=1e-5, atol=1e-4), (
        res_plain, jnp.sum(x))

    # Misaligned size: exercises the aligned-prefix path, the 2-core cdiv
    # split, the masked partial tile and the lane-remainder add.
    y = jax.random.normal(k1, (3, 5, 7, 11), dtype=jnp.float32)
    res_y = jax.block_until_ready(sum_loss_pallas(y, absolute=True))
    assert jnp.allclose(res_y, jnp.sum(jnp.abs(y)), rtol=1e-5, atol=1e-4), (
        res_y, jnp.sum(jnp.abs(y)))

    # Larger input: default byte-budget tiling (single 1 MiB tile).
    z = jax.random.normal(k2, (4, 16, 64, 64), dtype=jnp.float32)
    res_z = jax.block_until_ready(sum_loss_pallas(z, absolute=True))
    ref_z = jnp.sum(jnp.abs(z))
    assert jnp.allclose(res_z, ref_z, rtol=1e-4, atol=1e-2), (res_z, ref_z)

    # Same input with a small tile budget: exercises the multi-step
    # accumulation and the 2-core parallel split (grid=(2, 4)).
    res_z2 = jax.block_until_ready(
        sum_loss_pallas(z, absolute=True, tile_bytes=128 * 1024))
    assert jnp.allclose(res_z2, ref_z, rtol=1e-4, atol=1e-2), (res_z2, ref_z)

    print("KERNEL_OK")
</pallas_src>

<mosaic_0001>
module attributes {stable_mosaic.version = 11 : i64} {
  func.func @_sum_kernel(%arg0: i32, %arg1: i32, %arg2: memref<16x128xf32, #tpu.memory_space<vmem>>, %arg3: memref<16x128xf32, #tpu.memory_space<vmem>>) attributes {dimension_semantics = [#tpu.dimension_semantics<parallel>, #tpu.dimension_semantics<arbitrary>], iteration_bounds = array<i64: 1, 1>, scalar_prefetch = 0 : i64, scratch_operands = 0 : i64, tpu.core_type = #tpu.core_type<tc>, window_params = [{transform_indices = @transform_0, window_bounds = array<i64: 16, 128>}, {transform_indices = @transform_1, window_bounds = array<i64: 16, 128>}]} {
    %c0_i32 = arith.constant 0 : i32
    %0 = arith.cmpi eq, %arg1, %c0_i32 : i32
    %1 = arith.extui %0 : i1 to i32
    %c0_i32_0 = arith.constant 0 : i32
    %2 = arith.cmpi ne, %1, %c0_i32_0 : i32
    scf.if %2 {
      %cst_6 = arith.constant 0.000000e+00 : f32
      %10 = vector.broadcast %cst_6 : f32 to vector<16x128xf32>
      %c0_7 = arith.constant 0 : index
      %c0_8 = arith.constant 0 : index
      %11 = vector.load %arg3[%c0_7, %c0_8] : memref<16x128xf32, #tpu.memory_space<vmem>>, vector<16x128xf32>
      tpu.vector_store %arg3[%c0_7, %c0_8], %10 {strides = array<i32>} : memref<16x128xf32, #tpu.memory_space<vmem>>, vector<16x128xf32>,
    } else {
    }
    %c0 = arith.constant 0 : index
    %c0_1 = arith.constant 0 : index
    %3 = vector.load %arg2[%c0, %c0_1] : memref<16x128xf32, #tpu.memory_space<vmem>>, vector<16x128xf32>
    %4 = math.absf %3 : vector<16x128xf32>
    %c0_2 = arith.constant 0 : index
    %c0_3 = arith.constant 0 : index
    %5 = vector.load %arg3[%c0_2, %c0_3] : memref<16x128xf32, #tpu.memory_space<vmem>>, vector<16x128xf32>
    %6 = vector.shape_cast %4 : vector<16x128xf32> to vector<1x16x128xf32>
    %cst = arith.constant dense<0.000000e+00> : vector<16x128xf32>
    %7 = vector.multi_reduction <add>, %6, %cst [0] : vector<1x16x128xf32> to vector<16x128xf32>
    %8 = arith.addf %5, %7 : vector<16x128xf32>
    %c0_4 = arith.constant 0 : index
    %c0_5 = arith.constant 0 : index
    %9 = vector.load %arg3[%c0_4, %c0_5] : memref<16x128xf32, #tpu.memory_space<vmem>>, vector<16x128xf32>
    tpu.vector_store %arg3[%c0_4, %c0_5], %8 {strides = array<i32>} : memref<16x128xf32, #tpu.memory_space<vmem>>, vector<16x128xf32>,
    return
  }
  func.func @transform_0(%arg0: i32, %arg1: i32) -> (i32, i32) {
    %c1_i32 = arith.constant 1 : i32
    %0 = arith.muli %arg0, %c1_i32 : i32
    %1 = arith.addi %0, %arg1 : i32
    %c0_i32 = arith.constant 0 : i32
    %c0_i32_0 = arith.constant 0 : i32
    return %1, %c0_i32 : i32, i32
  }
  func.func @transform_1(%arg0: i32, %arg1: i32) -> (i32, i32) {
    %c0_i32 = arith.constant 0 : i32
    %c0_i32_0 = arith.constant 0 : i32
    return %arg0, %c0_i32 : i32, i32
  }
}

</mosaic_0001>

<bundles_post_ra>
// kernel: tpu_custom_call.1
= control target key start
LH: loop header
LB: loop body
LE: loop exit
PB: predicated region body
PF: predicated region fallthrough
CT: control target
= control target key end

     0   :  { %6 = vsyncpa [#allocation3], 0  ;;  %s145_s0 = inlined_call_operand.hbm [shape: f32[16,128], index: 0, kind: input, shape index: {}]   ;;  %s146_s1 = inlined_call_operand.hbm [shape: f32[16,128], index: 1, kind: output, shape index: {}]  }
   0x1   :  { %7 = vsyncpa [#allocation4], 0  ;;  %s16_s8 = sshll.u32 %s145_s0, 4  ;;  %s125_s9 = smov [#allocation2]   ;;  %s17_s8 = int_to_ptr.hbm [resolvable:$true] %s16_s8 }
   0x2   :  { %s18_s10 = sshll.u32 %s125_s9, 4  ;;  %s126_s11 = smov 128   ;;  %s19_s10 = int_to_ptr.vmem [resolvable:$true] %s18_s10 }
   0x3   :  { %s127_s12 = smov 8  }
   0x4   :  { %24 = dma.hbm_to_vmem [thread:$0]  %s17_s8, 256, %s19_s10, [#allocation3], %s126_s11, %s126_s11, %s127_s12  }
   0x5   :  { %121 = dma.done.wait [#allocation3], 256  }
   0x6   :  { %122 = vsyncadd [#allocation3], 4294967040  ;;  %v37_v0 = vld [vmem:[#allocation2] sm:$0xff]  ;;  %v38_v1 = vld [vmem:[#allocation2 + $0x8] sm:$0xff]  ;;  %s128_s13 = smov [#allocation5]   ;;  %s55_s17 = sshll.u32 %s146_s1, 4  ;;  %s56_s17 = int_to_ptr.hbm [resolvable:$true] %s55_s17 }
   0x7   :  { %v39_v2 = vand.u32 2147483647, %v37_v0  ;;  %v40_v3 = vand.u32 2147483647, %v38_v1  ;;  %s53_s14 = sshll.u32 %s128_s13, 4  ;;  %s54_s14 = int_to_ptr.vmem [resolvable:$true] %s53_s14 }
   0x9   :  { %47 = vst [vmem:[#allocation5] sm:$0xff] %v39_v2 }
   0xa   :  { %48 = vst [vmem:[#allocation5 + $0x8] sm:$0xff] %v40_v3 }
   0xb   :  { %61 = dma.vmem_to_hbm [thread:$0]  %s54_s14, 256, %s56_s17, [#allocation4], %s126_s11, %s126_s11, %s127_s12  }
   0xc   :  { %123 = dma.done.wait [#allocation4], 256  }
   0xd   :  { %124 = vsyncadd [#allocation4], 4294967040 }
   0xe   :  { %66 = vsyncpa [#allocation3], 1 }
   0xf   :  { %67 = vsyncpa [#allocation4], 1 }

</bundles_post_ra>
